<compile_context>
chip_gen: v7x
topology: tpu7x:2x2x1
jax: 0.10.0
libtpu: 0.0.40
codegen_flags: <defaults>
</compile_context>

<pallas_src>
import functools

import jax
import jax.numpy as jnp
from jax.experimental import pallas as pl
from jax.experimental.pallas import tpu as pltpu


IN_FEATURES = 768

_ACTIVATIONS = {
    "relu": lambda h: jnp.maximum(h, 0.0),
    "tanh": jnp.tanh,
    "silu": jax.nn.silu,
    "hardswish": lambda h: h * jnp.clip(h / 6.0 + 0.5, 0.0, 1.0),
    "gelu": lambda h: jax.nn.gelu(h, approximate=False),  # torch nn.GELU default = exact
}


def _round_up(n, m):
    return ((n + m - 1) // m) * m


def _mlp_head_kernel(x_ref, w1_ref, b1_ref, w2_ref, b2_ref, o_ref, *, act):
    # x_ref:  [TB, 768] (f32 or bf16)   w1_ref: [768, H]  bf16   b1_ref: [1, H]     f32
    # w2_ref: [H, C_pad] bf16           b2_ref: [1, C_pad] f32   o_ref:  [TB, C_pad] f32
    x = x_ref[...].astype(jnp.bfloat16)              # VPU cast; no-op if producer gave bf16
    h = jnp.dot(x, w1_ref[...], preferred_element_type=jnp.float32)
    h = act(h + b1_ref[...])                         # bias + activation in f32
    # Dropout(p=0.1) in eval mode == identity.
    # TODO(synk): training-mode dropout (pltpu.prng_seed + pltpu.prng_random_bits mask).
    h = h.astype(jnp.bfloat16)                       # bf16 into the second MXU pass
    logits = jnp.dot(h, w2_ref[...], preferred_element_type=jnp.float32)
    o_ref[...] = (logits + b2_ref[...]).astype(o_ref.dtype)


def prepare_params(w1, b1, w2, b2):
    """One-time parameter prep (call ONCE, reuse across forwards).

    w1: [768, H], w2: [H, C] are stored as [in, out] (torch weight.T);
    b1: [H] or [1, H], b2: [C] or [1, C].
    Casts weights to bf16 and pads the class dim to a lane-dense multiple of 128.
    """
    F, H = w1.shape
    C = w2.shape[1]
    C_pad = max(128, _round_up(C, 128))
    b1 = jnp.reshape(b1, (1, H)).astype(jnp.float32)
    b2 = jnp.reshape(b2, (1, C)).astype(jnp.float32)
    if C_pad != C:
        w2 = jnp.pad(w2, ((0, 0), (0, C_pad - C)))
        b2 = jnp.pad(b2, ((0, 0), (0, C_pad - C)))
    return (w1.astype(jnp.bfloat16), b1, w2.astype(jnp.bfloat16), b2, C)


def mpnet_classifier_forward(x, params, *, activation="relu", block_b=1024,
                             min_grid_steps=2, trim_classes=True):
    """x: [B, 768] (f32 or bf16), params = prepare_params(...). Returns f32 logits [B, C]
    (or the padded [B, C_pad] slab if trim_classes=False, which skips the
    non-lane-aligned column-slice copy when downstream can mask instead)."""
    if activation not in _ACTIVATIONS:
        raise ValueError(
            "Invalid activation function, must be one of: relu, tanh, silu, hardswish, gelu")
    w1_bf, b1_f32, w2_bf, b2_f32, C = params
    B, F = x.shape
    H = w1_bf.shape[1]
    C_pad = w2_bf.shape[1]

    # ---- Batch tile ------------------------------------------------------
    # Multiple of 8 sublanes; large by default so per-step grid overhead is
    # amortized.  Ragged final block is handled by Pallas (no jnp.pad of x).
    tb = max(8, min(_round_up(block_b, 8), _round_up(B, 8)))
    # v7x has 2 TensorCores: make sure the "parallel" batch axis has >= 2
    # grid steps whenever the batch allows it, so a core doesn't idle.
    if pl.cdiv(B, tb) < min_grid_steps and B >= 8 * min_grid_steps:
        tb = _round_up(pl.cdiv(B, min_grid_steps), 8)
    grid = (pl.cdiv(B, tb),)

    # ---- VMEM budget (explicit: v5e default scoped limit is only 16 MiB) --
    x_item = jnp.dtype(x.dtype).itemsize
    weight_bytes = 2 * ((F * H + H * C_pad) * 2 + (H + C_pad) * 4)   # double-buffered
    vmem_est = (2 * tb * F * x_item            # x tile, double-buffered
                + 2 * tb * C_pad * 4           # out tile, double-buffered
                + weight_bytes
                + tb * (2 * F + 6 * H + 8 * C_pad))   # in-kernel temporaries (rough)
    vmem_limit = min(max(int(vmem_est * 1.5) + (2 << 20), 16 << 20), 56 << 20)

    out = pl.pallas_call(
        functools.partial(_mlp_head_kernel, act=_ACTIVATIONS[activation]),
        out_shape=jax.ShapeDtypeStruct((B, C_pad), jnp.float32),
        grid=grid,
        in_specs=[
            pl.BlockSpec((tb, F), lambda i: (i, 0)),       # x: tiled over batch
            pl.BlockSpec((F, H), lambda i: (0, 0)),        # w1: constant index -> fetched once
            pl.BlockSpec((1, H), lambda i: (0, 0)),        # b1
            pl.BlockSpec((H, C_pad), lambda i: (0, 0)),    # w2 (class-padded, lane-dense)
            pl.BlockSpec((1, C_pad), lambda i: (0, 0)),    # b2
        ],
        out_specs=pl.BlockSpec((tb, C_pad), lambda i: (i, 0)),
        compiler_params=pltpu.CompilerParams(
            dimension_semantics=("parallel",),             # megacore sharding on v7x
            vmem_limit_bytes=vmem_limit,
        ),
    )(x, w1_bf, b1_f32, w2_bf, b2_f32)

    return out[:, :C] if trim_classes else out


def init_params(key, in_features=IN_FEATURES, hidden_size=256, num_classes=77):
    """Deterministic init mimicking nn.Linear's U(-1/sqrt(fan_in), 1/sqrt(fan_in))."""
    k1, k2, k3, k4 = jax.random.split(key, 4)
    bound1 = 1.0 / (in_features ** 0.5)
    bound2 = 1.0 / (hidden_size ** 0.5)
    # Stored as [in, out] == torch_weight.T
    w1 = jax.random.uniform(k1, (in_features, hidden_size), jnp.float32, -bound1, bound1)
    b1 = jax.random.uniform(k2, (1, hidden_size), jnp.float32, -bound1, bound1)
    w2 = jax.random.uniform(k3, (hidden_size, num_classes), jnp.float32, -bound2, bound2)
    b2 = jax.random.uniform(k4, (1, num_classes), jnp.float32, -bound2, bound2)
    return w1, b1, w2, b2


def _reference_bf16(x, w1, b1, w2, b2, act=lambda h: jnp.maximum(h, 0.0)):
    """Same math as the kernel (bf16 MXU inputs, f32 accumulation)."""
    xb = x.astype(jnp.bfloat16).astype(jnp.float32)
    w1b = w1.astype(jnp.bfloat16).astype(jnp.float32)
    w2b = w2.astype(jnp.bfloat16).astype(jnp.float32)
    h = act(xb @ w1b + b1)
    h = h.astype(jnp.bfloat16).astype(jnp.float32)
    return h @ w2b + b2


if __name__ == "__main__":
    key = jax.random.PRNGKey(0)
    kx, kp = jax.random.split(key)

    w1, b1, w2, b2 = init_params(kp)
    params = prepare_params(w1, b1, w2, b2)    # one-time prep, reused below

    # --- basic correctness, B = 8 (single grid step) -----------------------
    B = 8
    x = jax.random.normal(kx, (B, 768), jnp.float32)
    logits = jax.block_until_ready(mpnet_classifier_forward(x, params))
    assert logits.shape == (B, 77)
    assert jnp.allclose(logits, _reference_bf16(x, w1, b1, w2, b2), atol=2e-2, rtol=2e-2)
    # Loose check vs. full-f32 reference (bf16 quantization is intentional).
    ref_f32 = jnp.maximum(x @ w1 + b1, 0.0) @ w2 + b2
    assert jnp.allclose(logits, ref_f32, atol=1e-1, rtol=1e-1)

    # --- ragged batch (B = 13, not a multiple of 8; no host-side pad) ------
    x2 = jax.random.normal(kx, (13, 768), jnp.float32)
    logits2 = jax.block_until_ready(mpnet_classifier_forward(x2, params))
    assert logits2.shape == (13, 77)
    assert jnp.allclose(logits2, _reference_bf16(x2, w1, b1, w2, b2), atol=2e-2, rtol=2e-2)

    # --- multi-step grid (B = 40 -> 2 "parallel" steps, ragged last block) --
    x3 = jax.random.normal(kx, (40, 768), jnp.float32)
    logits3 = jax.block_until_ready(mpnet_classifier_forward(x3, params))
    assert logits3.shape == (40, 77)
    assert jnp.allclose(logits3, _reference_bf16(x3, w1, b1, w2, b2), atol=2e-2, rtol=2e-2)

    # --- bf16 input straight from an upstream producer ---------------------
    logits4 = jax.block_until_ready(
        mpnet_classifier_forward(x.astype(jnp.bfloat16), params))
    assert logits4.shape == (B, 77)
    assert jnp.allclose(logits4, _reference_bf16(x, w1, b1, w2, b2), atol=2e-2, rtol=2e-2)

    # --- alternate activation plumbing (tanh) -------------------------------
    logits5 = jax.block_until_ready(
        mpnet_classifier_forward(x, params, activation="tanh"))
    assert jnp.allclose(logits5, _reference_bf16(x, w1, b1, w2, b2, act=jnp.tanh),
                        atol=2e-2, rtol=2e-2)

    print("KERNEL_OK")
</pallas_src>

<mosaic_0001>
module attributes {stable_mosaic.version = 11 : i64} {
  func.func @_mlp_head_kernel(%arg0: i32, %arg1: memref<8x768xf32, #tpu.memory_space<vmem>>, %arg2: memref<768x256xbf16, #tpu.memory_space<vmem>>, %arg3: memref<1x256xf32, #tpu.memory_space<vmem>>, %arg4: memref<256x128xbf16, #tpu.memory_space<vmem>>, %arg5: memref<1x128xf32, #tpu.memory_space<vmem>>, %arg6: memref<8x128xf32, #tpu.memory_space<vmem>>) attributes {dimension_semantics = [#tpu.dimension_semantics<parallel>], iteration_bounds = array<i64: 1>, scalar_prefetch = 0 : i64, scratch_operands = 0 : i64, tpu.core_type = #tpu.core_type<tc>, window_params = [{transform_indices = @transform_0, window_bounds = array<i64: 8, 768>}, {pipeline_mode = #tpu.pipeline_mode<synchronous>, transform_indices = @transform_1, window_bounds = array<i64: 768, 256>}, {pipeline_mode = #tpu.pipeline_mode<synchronous>, transform_indices = @transform_2, window_bounds = array<i64: 1, 256>}, {pipeline_mode = #tpu.pipeline_mode<synchronous>, transform_indices = @transform_3, window_bounds = array<i64: 256, 128>}, {pipeline_mode = #tpu.pipeline_mode<synchronous>, transform_indices = @transform_4, window_bounds = array<i64: 1, 128>}, {transform_indices = @transform_5, window_bounds = array<i64: 8, 128>}]} {
    %c0 = arith.constant 0 : index
    %c0_0 = arith.constant 0 : index
    %0 = vector.load %arg1[%c0, %c0_0] : memref<8x768xf32, #tpu.memory_space<vmem>>, vector<8x768xf32>
    %1 = arith.truncf %0 : vector<8x768xf32> to vector<8x768xbf16>
    %c0_1 = arith.constant 0 : index
    %c0_2 = arith.constant 0 : index
    %2 = vector.load %arg2[%c0_1, %c0_2] : memref<768x256xbf16, #tpu.memory_space<vmem>>, vector<768x256xbf16>
    %cst = arith.constant dense<0.000000e+00> : vector<8x256xf32>
    %3 = tpu.matmul %1, %2, %cst {dimension_numbers = #tpu.dot_dimension_numbers<[1], [0], [0], [1], [0, 0, 1, 1], [], []>} : vector<8x768xbf16>, vector<768x256xbf16>, vector<8x256xf32> -> vector<8x256xf32>
    %c0_3 = arith.constant 0 : index
    %c0_4 = arith.constant 0 : index
    %4 = vector.load %arg3[%c0_3, %c0_4] : memref<1x256xf32, #tpu.memory_space<vmem>>, vector<1x256xf32>
    %5 = vector.broadcast %4 : vector<1x256xf32> to vector<8x256xf32>
    %6 = arith.addf %3, %5 : vector<8x256xf32>
    %cst_5 = arith.constant 0.000000e+00 : f32
    %7 = vector.broadcast %cst_5 : f32 to vector<8x256xf32>
    %8 = arith.maximumf %6, %7 : vector<8x256xf32>
    %9 = arith.truncf %8 : vector<8x256xf32> to vector<8x256xbf16>
    %c0_6 = arith.constant 0 : index
    %c0_7 = arith.constant 0 : index
    %10 = vector.load %arg4[%c0_6, %c0_7] : memref<256x128xbf16, #tpu.memory_space<vmem>>, vector<256x128xbf16>
    %cst_8 = arith.constant dense<0.000000e+00> : vector<8x128xf32>
    %11 = tpu.matmul %9, %10, %cst_8 {dimension_numbers = #tpu.dot_dimension_numbers<[1], [0], [0], [1], [0, 0, 1, 1], [], []>} : vector<8x256xbf16>, vector<256x128xbf16>, vector<8x128xf32> -> vector<8x128xf32>
    %c0_9 = arith.constant 0 : index
    %c0_10 = arith.constant 0 : index
    %12 = vector.load %arg5[%c0_9, %c0_10] : memref<1x128xf32, #tpu.memory_space<vmem>>, vector<1x128xf32>
    %13 = vector.broadcast %12 : vector<1x128xf32> to vector<8x128xf32>
    %14 = arith.addf %11, %13 : vector<8x128xf32>
    %c0_11 = arith.constant 0 : index
    %c0_12 = arith.constant 0 : index
    %15 = vector.load %arg6[%c0_11, %c0_12] : memref<8x128xf32, #tpu.memory_space<vmem>>, vector<8x128xf32>
    tpu.vector_store %arg6[%c0_11, %c0_12], %14 {strides = array<i32>} : memref<8x128xf32, #tpu.memory_space<vmem>>, vector<8x128xf32>,
    return
  }
  func.func @transform_0(%arg0: i32) -> (i32, i32) {
    %c0_i32 = arith.constant 0 : i32
    %c0_i32_0 = arith.constant 0 : i32
    return %arg0, %c0_i32 : i32, i32
  }
  func.func @transform_1(%arg0: i32) -> (i32, i32) {
    %c0_i32 = arith.constant 0 : i32
    %c0_i32_0 = arith.constant 0 : i32
    %c0_i32_1 = arith.constant 0 : i32
    return %c0_i32, %c0_i32_0 : i32, i32
  }
  func.func @transform_2(%arg0: i32) -> (i32, i32) {
    %c0_i32 = arith.constant 0 : i32
    %c0_i32_0 = arith.constant 0 : i32
    %c0_i32_1 = arith.constant 0 : i32
    return %c0_i32, %c0_i32_0 : i32, i32
  }
  func.func @transform_3(%arg0: i32) -> (i32, i32) {
    %c0_i32 = arith.constant 0 : i32
    %c0_i32_0 = arith.constant 0 : i32
    %c0_i32_1 = arith.constant 0 : i32
    return %c0_i32, %c0_i32_0 : i32, i32
  }
  func.func @transform_4(%arg0: i32) -> (i32, i32) {
    %c0_i32 = arith.constant 0 : i32
    %c0_i32_0 = arith.constant 0 : i32
    %c0_i32_1 = arith.constant 0 : i32
    return %c0_i32, %c0_i32_0 : i32, i32
  }
  func.func @transform_5(%arg0: i32) -> (i32, i32) {
    %c0_i32 = arith.constant 0 : i32
    %c0_i32_0 = arith.constant 0 : i32
    return %arg0, %c0_i32 : i32, i32
  }
}

</mosaic_0001>

<bundles_post_ra>
// kernel: tpu_custom_call.1
= control target key start
LH: loop header
LB: loop body
LE: loop exit
PB: predicated region body
PF: predicated region fallthrough
CT: control target
= control target key end

     0   :  { %10 = vsyncpa [#allocation3], 0  ;;  %s1477_s0 = inlined_call_operand.hbm [shape: f32[8,768], index: 0, kind: input, shape index: {}]   ;;  %s1478_s1 = inlined_call_operand.hbm [shape: bf16[768,256], index: 1, kind: input, shape index: {}]   ;;  %s1479_s2 = inlined_call_operand.vmem [shape: f32[1,256], index: 2, kind: input, shape index: {}]   ;;  %s1480_s3 = inlined_call_operand.hbm [shape: bf16[256,128], index: 3, kind: input, shape index: {}]   ;;  %s1481_s4 = inlined_call_operand.vmem [shape: f32[1,128], index: 4, kind: input, shape index: {}]   ;;  %s1482_s5 = inlined_call_operand.hbm [shape: f32[8,128], index: 5, kind: output, shape index: {}]  }
   0x1   :  { %11 = vsyncpa [#allocation6], 0 }
   0x2   :  { %12 = vsyncpa [#allocation4], 0  ;;  %s1385_s18 = smov [#allocation5]   ;;  %s1291_s22 = scalar_lea.hbm %s1478_s1, 12288 }
   0x3   :  { %s28_s19 = sshll.u32 %s1385_s18, 4  ;;  %p1292_p0 = scmp.ne.s32.totalorder %s1478_s1, %s1291_s22  ;;  %s29_s19 = int_to_ptr.vmem [resolvable:$true] %s28_s19 }
   0x4   :  { %p1295_p1 = scmp.lt.u32.totalorder %s1291_s22, %s1478_s1 }
   0x6   :  { %p1297_p2 = pnand %p1295_p1, %p1292_p0 }
   0x8   :  { %1300 = shalt.err (!%p1297_p2)
}
   0x9   :  { %s1301_s27 = scalar_lea.vmem %s29_s19, 12288  ;;  %p1306_p4 = scmp.lt.s32.totalorder %s29_s19, %s29_s19 }
   0xa   :  { %p1302_p3 = scmp.ne.s32.totalorder %s29_s19, %s1301_s27  ;;  %p1307_p5 = scmp.lt.s32.totalorder %s1301_s27, %s1301_s27 }
   0xc   :  { %p1308_p6 = por %p1307_p5, %p1306_p4 }
   0xe   :  { %p1309_p7 = pnand %p1308_p6, %p1302_p3 }
  0x10   :  { %1312 = shalt.err (!%p1309_p7)
}
  0x11   :  { %s1386_s28 = smov 128   ;;  %s1387_s29 = smov 8  }
  0x12   :  { %34 = dma.hbm_to_vmem [thread:$0]  %s1478_s1, 12288, %s29_s19, [#allocation6], %s1386_s28, %s1386_s28, %s1387_s29  }
  0x13   :  { %s1388_s7 = smov [#allocation2]   ;;  %s1389_s9 = smov [#allocation7]  }
  0x14   :  { %s19_s8 = sshll.u32 %s1388_s7, 4  ;;  %s42_s10 = sshll.u32 %s1389_s9, 4  ;;  %s20_s8 = int_to_ptr.vmem [resolvable:$true] %s19_s8  ;;  %s43_s10 = int_to_ptr.vmem [resolvable:$true] %s42_s10 }
  0x15   :  { %s1313_s13 = scalar_lea.hbm %s1477_s0, 768 }
  0x16   :  { %p1314_p8 = scmp.ne.s32.totalorder %s1477_s0, %s1313_s13  ;;  %p1317_p9 = scmp.lt.u32.totalorder %s1313_s13, %s1477_s0 }
  0x18   :  { %p1319_p10 = pnand %p1317_p9, %p1314_p8 }
  0x1a   :  { %1322 = shalt.err (!%p1319_p10)
}
  0x1b   :  { %s1323_s1 = scalar_lea.vmem %s20_s8, 768  ;;  %p1328_p12 = scmp.lt.s32.totalorder %s20_s8, %s20_s8 }
  0x1c   :  { %p1324_p11 = scmp.ne.s32.totalorder %s20_s8, %s1323_s1  ;;  %p1329_p13 = scmp.lt.s32.totalorder %s1323_s1, %s1323_s1 }
  0x1e   :  { %p1330_p0 = por %p1329_p13, %p1328_p12 }
  0x20   :  { %p1331_p1 = pnand %p1330_p0, %p1324_p11 }
  0x22   :  { %1334 = shalt.err (!%p1331_p1)
}
  0x23   :  { %22 = dma.hbm_to_vmem [thread:$0]  %s1477_s0, 768, %s20_s8, [#allocation3]  }
  0x24   :  { %s1335_s22 = scalar_lea.hbm %s1480_s3, 2048 }
  0x25   :  { %p1336_p2 = scmp.ne.s32.totalorder %s1480_s3, %s1335_s22  ;;  %p1339_p3 = scmp.lt.u32.totalorder %s1335_s22, %s1480_s3 }
  0x27   :  { %p1341_p4 = pnand %p1339_p3, %p1336_p2 }
  0x29   :  { %1344 = shalt.err (!%p1341_p4)
}
  0x2a   :  { %s1345_s27 = scalar_lea.vmem %s43_s10, 2048  ;;  %p1350_p6 = scmp.lt.s32.totalorder %s43_s10, %s43_s10 }
  0x2b   :  { %p1346_p5 = scmp.ne.s32.totalorder %s43_s10, %s1345_s27  ;;  %p1351_p7 = scmp.lt.s32.totalorder %s1345_s27, %s1345_s27 }
  0x2d   :  { %p1352_p8 = por %p1351_p7, %p1350_p6 }
  0x2f   :  { %p1353_p9 = pnand %p1352_p8, %p1346_p5 }
  0x31   :  { %1356 = shalt.err (!%p1353_p9)
}
  0x32   :  { %s1390_s0 = smov 64   ;;  %s1391_s28 = smov 4  }
  0x33   :  { %48 = dma.hbm_to_vmem [thread:$0]  %s1480_s3, 2048, %s43_s10, [#allocation6], %s1390_s0, %s1390_s0, %s1391_s28  }
  0x34   :  { %1379 = dma.done.wait [#allocation3], 768  }
  0x35   :  { %1380 = vsyncadd [#allocation3], 4294966528 }
  0x36   :  { %1381 = dma.done.wait [#allocation6], 14336  }
  0x37   :  { %1382 = vsyncadd [#allocation6], 4294952960  ;;  %v1131_v0 = vld [vmem:[#allocation5 + $0x104] ss:$8 sps:$4 sm:$0xff]   ;;  %v1133_v1 = vld [vmem:[#allocation5 + $0x100] ss:$8 sps:$4 sm:$0xff]  }
  0x38   :  { %702 = vmatprep.subr.bf16.mxu0 %v1131_v0  ;;  %v1134_v2 = vld [vmem:[#allocation5 + $0x114] ss:$8 sps:$4 sm:$0xff]   ;;  %v1136_v3 = vld [vmem:[#allocation5 + $0x110] ss:$8 sps:$4 sm:$0xff]   ;;  %v1137_v4 = vld [vmem:[#allocation5 + $0x124] ss:$8 sps:$4 sm:$0xff]  }
  0x39   :  { %703 = vmatpush1.bf16.msra.mxu0 %v1133_v1  ;;  %v1139_v5 = vld [vmem:[#allocation5 + $0x120] ss:$8 sps:$4 sm:$0xff]   ;;  %v1140_v6 = vld [vmem:[#allocation5 + $0x134] ss:$8 sps:$4 sm:$0xff]   ;;  %v1142_v7 = vld [vmem:[#allocation5 + $0x130] ss:$8 sps:$4 sm:$0xff]  }
  0x3a   :  { %704 = vmatprep.subr.bf16.mxu0 %v1134_v2  ;;  %v1143_v8 = vld [vmem:[#allocation5 + $0x144] ss:$8 sps:$4 sm:$0xff]   ;;  %v1145_v9 = vld [vmem:[#allocation5 + $0x140] ss:$8 sps:$4 sm:$0xff]   ;;  %v1146_v10 = vld [vmem:[#allocation5 + $0x154] ss:$8 sps:$4 sm:$0xff]  }
  0x3b   :  { %v1148_v11 = vld [vmem:[#allocation5 + $0x150] ss:$8 sps:$4 sm:$0xff]   ;;  %v1149_v12 = vld [vmem:[#allocation5 + $0x164] ss:$8 sps:$4 sm:$0xff]   ;;  %v1178_v14 = vld [vmem:[#allocation5] ss:$8 sps:$4 sm:$0xff]  }
  0x3c   :  { %v1176_v13 = vld [vmem:[#allocation5 + $0x4] ss:$8 sps:$4 sm:$0xff]   ;;  %v1151_v15 = vld [vmem:[#allocation5 + $0x160] ss:$8 sps:$4 sm:$0xff]   ;;  %v1152_v16 = vld [vmem:[#allocation5 + $0x174] ss:$8 sps:$4 sm:$0xff]  }
  0x3d   :  { %705 = vmatpush1.bf16.msra.mxu0 %v1136_v3  ;;  %661 = vmatprep.subr.bf16.mxu1 %v1176_v13  ;;  %v1182_v17 = vld [vmem:[#allocation5 + $0x14] ss:$8 sps:$4 sm:$0xff]   ;;  %v1184_v18 = vld [vmem:[#allocation5 + $0x10] ss:$8 sps:$4 sm:$0xff]   ;;  %v64_v19 = vld [vmem:[#allocation2 + $0x18] sm:$0xff]  ;;  %s1392_s8 = smov [#allocation8]  }
  0x3e   :  { %706 = vmatprep.subr.bf16.mxu0 %v1137_v4  ;;  %662 = vmatpush1.bf16.msra.mxu1 %v1178_v14  ;;  %v1154_v20 = vld [vmem:[#allocation5 + $0x170] ss:$8 sps:$4 sm:$0xff]   ;;  %v70_v21 = vpack.c.bf16 %v64_v19, %v64_v19  ;;  %v1188_v22 = vld [vmem:[#allocation5 + $0x24] ss:$8 sps:$4 sm:$0xff]   ;;  %v1190_v23 = vld [vmem:[#allocation5 + $0x20] ss:$8 sps:$4 sm:$0xff]  }
  0x3f   :  { %663 = vmatprep.subr.bf16.mxu1 %v1182_v17  ;;  %v1155_v24 = vld [vmem:[#allocation5 + $0x184] ss:$8 sps:$4 sm:$0xff]   ;;  %v1194_v25 = vld [vmem:[#allocation5 + $0x34] ss:$8 sps:$4 sm:$0xff]   ;;  %v1157_v26 = vld [vmem:[#allocation5 + $0x180] ss:$8 sps:$4 sm:$0xff]  }
  0x40   :  { %734 = vmatprep.mubr.bf16.mxu0 %v70_v21  ;;  %v1196_v27 = vld [vmem:[#allocation5 + $0x30] ss:$8 sps:$4 sm:$0xff]   ;;  %v1158_v28 = vld [vmem:[#allocation5 + $0x194] ss:$8 sps:$4 sm:$0xff]   ;;  %v1200_v29 = vld [vmem:[#allocation5 + $0x44] ss:$8 sps:$4 sm:$0xff]  }
  0x41   :  { %707 = vmatpush1.bf16.msra.mxu0 %v1139_v5  ;;  %v1160_v30 = vld [vmem:[#allocation5 + $0x190] ss:$8 sps:$4 sm:$0xff]   ;;  %v1202_v31 = vld [vmem:[#allocation5 + $0x40] ss:$8 sps:$4 sm:$0xff]   ;;  %v1161_v32 = vld [vmem:[#allocation5 + $0x1a4] ss:$8 sps:$4 sm:$0xff]  }
  0x42   :  { %708 = vmatprep.subr.bf16.mxu0 %v1140_v6  ;;  %664 = vmatpush1.bf16.msra.mxu1 %v1184_v18  ;;  %v1206_v33 = vld [vmem:[#allocation5 + $0x54] ss:$8 sps:$4 sm:$0xff]   ;;  %v1163_v34 = vld [vmem:[#allocation5 + $0x1a0] ss:$8 sps:$4 sm:$0xff]   ;;  %v1208_v35 = vld [vmem:[#allocation5 + $0x50] ss:$8 sps:$4 sm:$0xff]  }
  0x43   :  { %665 = vmatprep.subr.bf16.mxu1 %v1188_v22  ;;  %v1164_v36 = vld [vmem:[#allocation5 + $0x1b4] ss:$8 sps:$4 sm:$0xff]   ;;  %v1212_v37 = vld [vmem:[#allocation5 + $0x64] ss:$8 sps:$4 sm:$0xff]   ;;  %v1166_v38 = vld [vmem:[#allocation5 + $0x1b0] ss:$8 sps:$4 sm:$0xff]  }
  0x44   :  { %v1214_v39 = vld [vmem:[#allocation5 + $0x60] ss:$8 sps:$4 sm:$0xff]   ;;  %v1167_v40 = vld [vmem:[#allocation5 + $0x1c4] ss:$8 sps:$4 sm:$0xff]   ;;  %v1218_v41 = vld [vmem:[#allocation5 + $0x74] ss:$8 sps:$4 sm:$0xff]  }
  0x45   :  { %709 = vmatpush1.bf16.msra.mxu0 %v1142_v7  ;;  %v1169_v42 = vld [vmem:[#allocation5 + $0x1c0] ss:$8 sps:$4 sm:$0xff]   ;;  %v1220_v43 = vld [vmem:[#allocation5 + $0x70] ss:$8 sps:$4 sm:$0xff]   ;;  %v1170_v44 = vld [vmem:[#allocation5 + $0x1d4] ss:$8 sps:$4 sm:$0xff]  }
  0x46   :  { %710 = vmatprep.subr.bf16.mxu0 %v1143_v8  ;;  %666 = vmatpush1.bf16.msra.mxu1 %v1190_v23  ;;  %v1224_v45 = vld [vmem:[#allocation5 + $0x84] ss:$8 sps:$4 sm:$0xff]   ;;  %v1172_v46 = vld [vmem:[#allocation5 + $0x1d0] ss:$8 sps:$4 sm:$0xff]   ;;  %v1226_v47 = vld [vmem:[#allocation5 + $0x80] ss:$8 sps:$4 sm:$0xff]  }
  0x47   :  { %667 = vmatprep.subr.bf16.mxu1 %v1194_v25  ;;  %v1173_v48 = vld [vmem:[#allocation5 + $0x1e4] ss:$8 sps:$4 sm:$0xff]   ;;  %v1230_v49 = vld [vmem:[#allocation5 + $0x94] ss:$8 sps:$4 sm:$0xff]   ;;  %v1175_v50 = vld [vmem:[#allocation5 + $0x1e0] ss:$8 sps:$4 sm:$0xff]  }
  0x48   :  { %v1232_v51 = vld [vmem:[#allocation5 + $0x90] ss:$8 sps:$4 sm:$0xff]   ;;  %v1179_v52 = vld [vmem:[#allocation5 + $0x1f4] ss:$8 sps:$4 sm:$0xff]   ;;  %v1236_v53 = vld [vmem:[#allocation5 + $0xa4] ss:$8 sps:$4 sm:$0xff]  }
  0x49   :  { %711 = vmatpush1.bf16.msra.mxu0 %v1145_v9  ;;  %v1181_v54 = vld [vmem:[#allocation5 + $0x1f0] ss:$8 sps:$4 sm:$0xff]   ;;  %v63_v55 = vld [vmem:[#allocation2 + $0x10] sm:$0xff]  ;;  %v1242_v58 = vld [vmem:[#allocation5 + $0xb4] ss:$8 sps:$4 sm:$0xff]   ;;  %s970_s9 = sshll.u32 %s1392_s8, 4  ;;  %s971_s9 = int_to_ptr.vmem [resolvable:$true] %s970_s9 }
  0x4a   :  { %712 = vmatprep.subr.bf16.mxu0 %v1146_v10  ;;  %668 = vmatpush1.bf16.msra.mxu1 %v1196_v27  ;;  %v1238_v56 = vld [vmem:[#allocation5 + $0xa0] ss:$8 sps:$4 sm:$0xff]   ;;  %v1187_v57 = vld [vmem:[#allocation5 + $0x204] ss:$8 sps:$4 sm:$0xff]   ;;  %v69_v60 = vpack.c.bf16 %v63_v55, %v63_v55  ;;  %v1193_v61 = vld [vmem:[#allocation5 + $0x214] ss:$8 sps:$4 sm:$0xff]   ;;  %p1362_p11 = scmp.lt.s32.totalorder %s971_s9, %s971_s9 }
  0x4b   :  { %669 = vmatprep.subr.bf16.mxu1 %v1200_v29  ;;  %v1185_v59 = vld [vmem:[#allocation5 + $0x200] ss:$8 sps:$4 sm:$0xff]   ;;  %v1244_v62 = vld [vmem:[#allocation5 + $0xb0] ss:$8 sps:$4 sm:$0xff]   ;;  %v1248_v0 = vld [vmem:[#allocation5 + $0xc4] ss:$8 sps:$4 sm:$0xff]  }
  0x4c   :  { %v62_v63 = vld [vmem:[#allocation2 + $0x8] sm:$0xff]  ;;  %v1199_v4 = vld [vmem:[#allocation5 + $0x224] ss:$8 sps:$4 sm:$0xff]   ;;  %v1250_v6 = vld [vmem:[#allocation5 + $0xc0] ss:$8 sps:$4 sm:$0xff]   ;;  %s1357_s10 = scalar_lea.vmem %s971_s9, 128 }
  0x4d   :  { %713 = vmatpush1.bf16.msra.mxu0 %v1148_v11  ;;  %v68_v1 = vpack.c.bf16 %v62_v63, %v62_v63  ;;  %v1191_v2 = vld [vmem:[#allocation5 + $0x210] ss:$8 sps:$4 sm:$0xff]   ;;  %v1254_v7 = vld [vmem:[#allocation5 + $0xd4] ss:$8 sps:$4 sm:$0xff]   ;;  %v1197_v8 = vld [vmem:[#allocation5 + $0x220] ss:$8 sps:$4 sm:$0xff]   ;;  %p1358_p10 = scmp.ne.s32.totalorder %s971_s9, %s1357_s10  ;;  %p1363_p12 = scmp.lt.s32.totalorder %s1357_s10, %s1357_s10 }
  0x4e   :  { %714 = vmatprep.subr.bf16.mxu0 %v1149_v12  ;;  %670 = vmatpush1.bf16.msra.mxu1 %v1202_v31  ;;  %v66_v3 = vld [vmem:[#allocation2 + $0x28] sm:$0xff]  ;;  %v1260_v11 = vld [vmem:[#allocation5 + $0xe4] ss:$8 sps:$4 sm:$0xff]   ;;  %v1262_v14 = vld [vmem:[#allocation5 + $0xe0] ss:$8 sps:$4 sm:$0xff]  }
  0x4f   :  { %671 = vmatprep.subr.bf16.mxu1 %v1206_v33  ;;  %693 = vmatprep.mubr.bf16.mxu1 %v68_v1  ;;  %v72_v5 = vpack.c.bf16 %v66_v3, %v66_v3  ;;  %v1205_v9 = vld [vmem:[#allocation5 + $0x234] ss:$8 sps:$4 sm:$0xff]   ;;  %v1256_v10 = vld [vmem:[#allocation5 + $0xd0] ss:$8 sps:$4 sm:$0xff]   ;;  %v1211_v13 = vld [vmem:[#allocation5 + $0x244] ss:$8 sps:$4 sm:$0xff]   ;;  %p1364_p13 = por %p1363_p12, %p1362_p11 }
  0x50   :  { %v1203_v12 = vld [vmem:[#allocation5 + $0x230] ss:$8 sps:$4 sm:$0xff]   ;;  %v1217_v19 = vld [vmem:[#allocation5 + $0x254] ss:$8 sps:$4 sm:$0xff]   ;;  %v1276_v23 = vld [vmem:[#allocation7] sm:$0xff]  }
  0x51   :  { %715 = vmatpush1.bf16.msra.mxu0 %v1151_v15  ;;  %v1266_v15 = vld [vmem:[#allocation5 + $0xf4] ss:$8 sps:$4 sm:$0xff]   ;;  %v1268_v17 = vld [vmem:[#allocation5 + $0xf0] ss:$8 sps:$4 sm:$0xff]   ;;  %v1277_v25 = vld [vmem:[#allocation7 + $0x48] sm:$0xff]   ;;  %p1365_p0 = pnand %p1364_p13, %p1358_p10 }
  0x52   :  { %716 = vmatprep.subr.bf16.mxu0 %v1152_v16  ;;  %672 = vmatpush1.bf16.msra.mxu1 %v1208_v35  ;;  %v1209_v16 = vld [vmem:[#allocation5 + $0x240] ss:$8 sps:$4 sm:$0xff]   ;;  %v61_v18 = vld [vmem:[#allocation2] sm:$0xff]  ;;  %v1281_v33 = vld [vmem:[#allocation7 + $0x58] sm:$0xff]  }
  0x53   :  { %673 = vmatprep.subr.bf16.mxu1 %v1212_v37  ;;  %v67_v21 = vpack.c.bf16 %v61_v18, %v61_v18  ;;  %v1215_v22 = vld [vmem:[#allocation5 + $0x250] ss:$8 sps:$4 sm:$0xff]   ;;  %v1278_v27 = vld [vmem:[#allocation7 + $0x8] sm:$0xff]   ;;  %v1283_v37 = vld [vmem:[#allocation7 + $0x60] sm:$0xff]  }
  0x54   :  { %v1279_v29 = vld [vmem:[#allocation7 + $0x50] sm:$0xff]   ;;  %v1282_v35 = vld [vmem:[#allocation7 + $0x18] sm:$0xff]   ;;  %v1286_v55 = vld [vmem:[#allocation7 + $0x28] sm:$0xff]  }
  0x55   :  { %717 = vmatpush1.bf16.msra.mxu0 %v1154_v20  ;;  %v1275_v20 = vld [vmem:[#allocation7 + $0x40] sm:$0xff]   ;;  %v1280_v31 = vld [vmem:[#allocation7 + $0x10] sm:$0xff]  }
  0x56   :  { %718 = vmatprep.subr.bf16.mxu0 %v1155_v24  ;;  %674 = vmatpush1.bf16.msra.mxu1 %v1214_v39  ;;  %v1223_v24 = vld [vmem:[#allocation5 + $0x264] ss:$8 sps:$4 sm:$0xff]   ;;  %v169_v3 = vld [vmem:[%s1479_s2] sm:$0x3] }
  0x57   :  { %675 = vmatprep.subr.bf16.mxu1 %v1218_v41  ;;  %v1284_v39 = vld [vmem:[#allocation7 + $0x20] sm:$0xff]  }
  0x58   :  { %v1245_v41 = vld [vmem:[#allocation5 + $0x2a0] ss:$8 sps:$4 sm:$0xff]  }
  0x59   :  { %719 = vmatpush1.bf16.msra.mxu0 %v1157_v26  ;;  %v1221_v26 = vld [vmem:[#allocation5 + $0x260] ss:$8 sps:$4 sm:$0xff]  }
  0x5a   :  { %720 = vmatprep.subr.bf16.mxu0 %v1158_v28  ;;  %676 = vmatpush1.bf16.msra.mxu1 %v1220_v43  ;;  %v1229_v28 = vld [vmem:[#allocation5 + $0x274] ss:$8 sps:$4 sm:$0xff]   ;;  %v1251_v43 = vld [vmem:[#allocation5 + $0x2b0] ss:$8 sps:$4 sm:$0xff]  }
  0x5b   :  { %677 = vmatprep.subr.bf16.mxu1 %v1224_v45  ;;  %v1257_v45 = vld [vmem:[#allocation5 + $0x2c0] ss:$8 sps:$4 sm:$0xff]  }
  0x5d   :  { %721 = vmatpush1.bf16.msra.mxu0 %v1160_v30  ;;  %v1227_v30 = vld [vmem:[#allocation5 + $0x270] ss:$8 sps:$4 sm:$0xff]  }
  0x5e   :  { %722 = vmatprep.subr.bf16.mxu0 %v1161_v32  ;;  %678 = vmatpush1.bf16.msra.mxu1 %v1226_v47  ;;  %v1235_v32 = vld [vmem:[#allocation5 + $0x284] ss:$8 sps:$4 sm:$0xff]   ;;  %v1263_v47 = vld [vmem:[#allocation5 + $0x2d0] ss:$8 sps:$4 sm:$0xff]  }
  0x5f   :  { %679 = vmatprep.subr.bf16.mxu1 %v1230_v49  ;;  %v1269_v49 = vld [vmem:[#allocation5 + $0x2e0] ss:$8 sps:$4 sm:$0xff]  }
  0x61   :  { %723 = vmatpush1.bf16.msra.mxu0 %v1163_v34  ;;  %v1233_v34 = vld [vmem:[#allocation5 + $0x280] ss:$8 sps:$4 sm:$0xff]  }
  0x62   :  { %724 = vmatprep.subr.bf16.mxu0 %v1164_v36  ;;  %680 = vmatpush1.bf16.msra.mxu1 %v1232_v51  ;;  %v1241_v36 = vld [vmem:[#allocation5 + $0x294] ss:$8 sps:$4 sm:$0xff]   ;;  %v1272_v51 = vld [vmem:[#allocation5 + $0x2f0] ss:$8 sps:$4 sm:$0xff]  }
  0x63   :  { %681 = vmatprep.subr.bf16.mxu1 %v1236_v53 }
  0x65   :  { %725 = vmatpush1.bf16.msra.mxu0 %v1166_v38  ;;  %v1239_v38 = vld [vmem:[#allocation5 + $0x290] ss:$8 sps:$4 sm:$0xff]  }
  0x66   :  { %726 = vmatprep.subr.bf16.mxu0 %v1167_v40  ;;  %682 = vmatpush1.bf16.msra.mxu1 %v1238_v56  ;;  %v1247_v40 = vld [vmem:[#allocation5 + $0x2a4] ss:$8 sps:$4 sm:$0xff]   ;;  %v1287_v56 = vld [vmem:[#allocation7 + $0x70] sm:$0xff]  }
  0x67   :  { %683 = vmatprep.subr.bf16.mxu1 %v1242_v58  ;;  %v1289_v58 = vld [vmem:[#allocation7 + $0x78] sm:$0xff]  }
  0x69   :  { %727 = vmatpush1.bf16.msra.mxu0 %v1169_v42  ;;  %v1253_v42 = vld [vmem:[#allocation5 + $0x2b4] ss:$8 sps:$4 sm:$0xff]  }
  0x6a   :  { %728 = vmatprep.subr.bf16.mxu0 %v1170_v44  ;;  %684 = vmatpush1.bf16.msra.mxu1 %v1244_v62  ;;  %v1259_v44 = vld [vmem:[#allocation5 + $0x2c4] ss:$8 sps:$4 sm:$0xff]  }
  0x6b   :  { %685 = vmatprep.subr.bf16.mxu1 %v1248_v0  ;;  %v171_v0 = vlaneseq }
  0x6d   :  { %729 = vmatpush1.bf16.msra.mxu0 %v1172_v46  ;;  %v1265_v46 = vld [vmem:[#allocation5 + $0x2d4] ss:$8 sps:$4 sm:$0xff]   ;;  %v172_v1 = vshrl.u32 %v171_v0, 7 }
  0x6e   :  { %730 = vmatprep.subr.bf16.mxu0 %v1173_v48  ;;  %686 = vmatpush1.bf16.msra.mxu1 %v1250_v6  ;;  %v1271_v48 = vld [vmem:[#allocation5 + $0x2e4] ss:$8 sps:$4 sm:$0xff]  }
  0x6f   :  { %687 = vmatprep.subr.bf16.mxu1 %v1254_v7 }
  0x71   :  { %731 = vmatpush1.bf16.msra.mxu0 %v1175_v50  ;;  %v1274_v50 = vld [vmem:[#allocation5 + $0x2f4] ss:$8 sps:$4 sm:$0xff]  }
  0x72   :  { %732 = vmatprep.subr.bf16.mxu0 %v1179_v52  ;;  %688 = vmatpush1.bf16.msra.mxu1 %v1256_v10  ;;  %v65_v52 = vld [vmem:[#allocation2 + $0x20] sm:$0xff] }
  0x73   :  { %689 = vmatprep.subr.bf16.mxu1 %v1260_v11  ;;  %v71_v53 = vpack.c.bf16 %v65_v52, %v65_v52 }
  0x75   :  { %733 = vmatpush1.bf16.msra.mxu0 %v1181_v54  ;;  %v1285_v54 = vld [vmem:[#allocation7 + $0x68] sm:$0xff]  }
  0x76   :  { %743 = vmatprep.subr.bf16.mxu0 %v1187_v57  ;;  %690 = vmatpush1.bf16.msra.mxu1 %v1262_v14  ;;  %v1288_v57 = vld [vmem:[#allocation7 + $0x30] sm:$0xff]  }
  0x77   :  { %691 = vmatprep.subr.bf16.mxu1 %v1266_v15 }
  0x78   :  { %735 = vmatmul.mubr.bf16.vlgmr.msra.gmra.mrb[0].mxu0 %v69_v60 }
  0x79   :  { %744 = vmatpush1.bf16.msra.mxu0 %v1185_v59  ;;  %775 = vmatprep.mubr.bf16.mxu0 %v72_v5  ;;  %v1290_v59 = vld [vmem:[#allocation7 + $0x38] sm:$0xff]  }
  0x7a   :  { %745 = vmatprep.subr.bf16.mxu0 %v1193_v61  ;;  %692 = vmatpush1.bf16.msra.mxu1 %v1268_v17 }
  0x7b   :  { %1093 = vmatprep.subr.bf16.mxu1 %v1275_v20  ;;  %v1076_v20 = vld [vmem:[%s1481_s4] ss:$0 sm:$0xff] }
  0x7d   :  { %746 = vmatpush1.bf16.msra.mxu0 %v1191_v2  ;;  %694 = vmatmul.mubr.bf16.vlgmr.msra.gmra.mrb[0].mxu1 %v67_v21  ;;  %v173_v2 = vsub.s32 0, %v172_v1 }
  0x7e   :  { %747 = vmatprep.subr.bf16.mxu0 %v1199_v4  ;;  %1094 = vmatpush3.bf16.msra.mxu1 %v1276_v23  ;;  %v177_v4 = vsub.s32 1, %v172_v1 }
  0x7f   :  { %1095 = vmatprep.subr.bf16.mxu1 %v1277_v25  ;;  %v174_v5 = vrot.slane %v169_v3, %v173_v2 }
  0x80   :  { %v178_v6 = vrot.slane %v169_v3, %v177_v4 }
  0x81   :  { %748 = vmatpush1.bf16.msra.mxu0 %v1197_v8 }
  0x82   :  { %749 = vmatprep.subr.bf16.mxu0 %v1205_v9  ;;  %1096 = vmatpush3.bf16.msra.mxu1 %v1278_v27 }
  0x83   :  { %1097 = vmatprep.subr.bf16.mxu1 %v1279_v29 }
  0x85   :  { %750 = vmatpush1.bf16.msra.mxu0 %v1203_v12 }
  0x86   :  { %751 = vmatprep.subr.bf16.mxu0 %v1211_v13  ;;  %1098 = vmatpush3.bf16.msra.mxu1 %v1280_v31 }
  0x87   :  { %1099 = vmatprep.subr.bf16.mxu1 %v1281_v33 }
  0x89   :  { %752 = vmatpush1.bf16.msra.mxu0 %v1209_v16 }
  0x8a   :  { %753 = vmatprep.subr.bf16.mxu0 %v1217_v19  ;;  %1100 = vmatpush3.bf16.msra.mxu1 %v1282_v35 }
  0x8b   :  { %1101 = vmatprep.subr.bf16.mxu1 %v1283_v37 }
  0x8d   :  { %754 = vmatpush1.bf16.msra.mxu0 %v1215_v22 }
  0x8e   :  { %755 = vmatprep.subr.bf16.mxu0 %v1223_v24  ;;  %1102 = vmatpush3.bf16.msra.mxu1 %v1284_v39 }
  0x8f   :  { %1103 = vmatprep.subr.bf16.mxu1 %v1285_v54 }
  0x91   :  { %756 = vmatpush1.bf16.msra.mxu0 %v1221_v26 }
  0x92   :  { %757 = vmatprep.subr.bf16.mxu0 %v1229_v28  ;;  %1104 = vmatpush3.bf16.msra.mxu1 %v1286_v55 }
  0x93   :  { %1105 = vmatprep.subr.bf16.mxu1 %v1287_v56 }
  0x95   :  { %758 = vmatpush1.bf16.msra.mxu0 %v1227_v30 }
  0x96   :  { %759 = vmatprep.subr.bf16.mxu0 %v1235_v32  ;;  %1106 = vmatpush3.bf16.msra.mxu1 %v1288_v57 }
  0x97   :  { %1107 = vmatprep.subr.bf16.mxu1 %v1289_v58 }
  0x99   :  { %760 = vmatpush1.bf16.msra.mxu0 %v1233_v34 }
  0x9a   :  { %761 = vmatprep.subr.bf16.mxu0 %v1241_v36  ;;  %1108 = vmatpush3.bf16.msra.mxu1 %v1290_v59 }
  0x9d   :  { %762 = vmatpush1.bf16.msra.mxu0 %v1239_v38 }
  0x9e   :  { %763 = vmatprep.subr.bf16.mxu0 %v1247_v40 }
  0xa1   :  { %764 = vmatpush1.bf16.msra.mxu0 %v1245_v41 }
  0xa2   :  { %765 = vmatprep.subr.bf16.mxu0 %v1253_v42 }
  0xa5   :  { %766 = vmatpush1.bf16.msra.mxu0 %v1251_v43 }
  0xa6   :  { %767 = vmatprep.subr.bf16.mxu0 %v1259_v44 }
  0xa9   :  { %768 = vmatpush1.bf16.msra.mxu0 %v1257_v45 }
  0xaa   :  { %769 = vmatprep.subr.bf16.mxu0 %v1265_v46 }
  0xad   :  { %770 = vmatpush1.bf16.msra.mxu0 %v1263_v47 }
  0xae   :  { %771 = vmatprep.subr.bf16.mxu0 %v1271_v48 }
  0xb1   :  { %772 = vmatpush1.bf16.msra.mxu0 %v1269_v49 }
  0xb2   :  { %773 = vmatprep.subr.bf16.mxu0 %v1274_v50 }
  0xb5   :  { %774 = vmatpush1.bf16.msra.mxu0 %v1272_v51 }
  0xb8   :  { %776 = vmatmul.mubr.bf16.vlgmr.msra.gmra.mrb[0].mxu0 %v71_v53 }
 0x150   :  { %v695_v60 = vpop.f32.mrb[0].mxu1 }
 0x151   :  { %v697_v61 = vpop.f32.mrb[1].mxu1  ;;  %v696_v7 = vadd.f32 %v695_v60, %v174_v5 }
 0x152   :  { %v699_v62 = vpop.f32.mrb[2].mxu1  ;;  %v698_v8 = vadd.f32 %v697_v61, %v178_v6 }
 0x153   :  { %v700_v63 = vpop.f32.mrb[3].mxu1 }
 0x18b   :  { %v777_v9 = vpop.f32.mrb[0].mxu0 }
 0x18c   :  { %v1116_v10 = vadd.f32 %v777_v9, %v696_v7  ;;  %v779_v11 = vpop.f32.mrb[1].mxu0 }
 0x18d   :  { %v1118_v12 = vadd.f32 %v779_v11, %v698_v8  ;;  %v781_v13 = vpop.f32.mrb[2].mxu0 }
 0x18e   :  { %v784_v14 = vmax.f32 %v1116_v10, 0.0  ;;  %v782_v15 = vpop.f32.mrb[3].mxu0 }
 0x18f   :  { %v785_v16 = vmax.f32 %v1118_v12, 0.0 }
 0x190   :  { %v786_v18 = vpack.c.bf16 %v784_v14, %v784_v14 }
 0x191   :  { %v787_v17 = vpack.c.bf16 %v785_v16, %v785_v16 }
 0x193   :  { %955 = vmatprep.mubr.bf16.mxu1 %v787_v17 }
 0x194   :  { %956 = vmatmul.mubr.bf16.vlgmr.msra.gmra.mrb[4].mxu1 %v786_v18 }
 0x267   :  { %v1109_v19 = vpop.f32.mrb[4].mxu1 }
 0x268   :  { %v1110_v21 = vpop.f32.mrb[5].mxu1 }
 0x269   :  { %v1111_v22 = vadd.f32 %v1110_v21, %v1109_v19  ;;  %v1112_v23 = vpop.f32.mrb[6].mxu1 }
 0x26a   :  { %v1113_v24 = vpop.f32.mrb[7].mxu1 }
 0x26b   :  { %v958_v25 = vadd.f32 %v1111_v22, %v1076_v20 }
 0x26d   :  { %963 = vst [vmem:[#allocation8] sm:$0xff] %v958_v25 }
 0x26e   :  { %1368 = shalt.err (!%p1365_p0)
}
 0x26f   :  { %s1369_s4 = scalar_lea.hbm %s1482_s5, 128 }
 0x270   :  { %p1370_p1 = scmp.ne.s32.totalorder %s1482_s5, %s1369_s4  ;;  %p1373_p2 = scmp.lt.u32.totalorder %s1369_s4, %s1482_s5 }
 0x272   :  { %p1375_p3 = pnand %p1373_p2, %p1370_p1 }
 0x274   :  { %1378 = shalt.err (!%p1375_p3)
}
 0x275   :  { %973 = dma.vmem_to_hbm [thread:$0]  %s971_s9, 128, %s1482_s5, [#allocation4]  }
 0x276   :  { %1383 = dma.done.wait [#allocation4], 128  }
 0x277   :  { %1384 = vsyncadd [#allocation4], 4294967168 }
 0x278   :  { %977 = vsyncpa [#allocation3], 1 }
 0x279   :  { %978 = vsyncpa [#allocation6], 1 }
 0x27a   :  { %979 = vsyncpa [#allocation4], 1 }

</bundles_post_ra>
